<compile_context>
chip_gen: v5e
topology: v5e:2x2
jax: 0.10.0
libtpu: 0.0.40
codegen_flags: <defaults>
</compile_context>

<pallas_src>
import jax
import jax.numpy as jnp
from jax.experimental import pallas as pl
from jax.experimental.pallas import tpu as pltpu

_LANE = 128          # TPU lane width
_SUBLANE_F32 = 8     # f32 sublane packing
_SUBLANE_BF16 = 16   # bf16 sublane packing
_H1 = 128            # fc1 width (already lane-aligned)
_H2 = 64             # fc2 width in the PyTorch module (padded to 128 below)


def _round_up(n, m):
    return ((n + m - 1) // m) * m


def _cdiv(a, b):
    return (a + b - 1) // b


def _maybe_cast(a, dt):
    return a if a.dtype == dt else a.astype(dt)


def _mlp_kernel(x_ref, w1_ref, b1_ref, w2_ref, b2_ref, w3_ref, b3_ref, o_ref):
    # x arrives in its native dtype; cast in-vreg (no-op when compute is f32).
    x = x_ref[...].astype(w1_ref.dtype)
    # fc1 + ReLU (f32 MXU accumulation, f32 bias/activation)
    h1 = jnp.dot(x, w1_ref[...], preferred_element_type=jnp.float32)
    h1 = jnp.maximum(h1 + b1_ref[...], 0.0)
    # fc2 + ReLU (hidden padded 64 -> 128: padded cols are relu(0) = 0)
    h2 = jnp.dot(h1.astype(w2_ref.dtype), w2_ref[...],
                 preferred_element_type=jnp.float32)
    h2 = jnp.maximum(h2 + b2_ref[...], 0.0)
    # fc3 (no activation); zero-padded w3 rows contribute nothing
    out = jnp.dot(h2.astype(w3_ref.dtype), w3_ref[...],
                  preferred_element_type=jnp.float32)
    o_ref[...] = (out + b3_ref[...]).astype(o_ref.dtype)


def _derive_vmem_limit(tb, input_dim, output_dim, in_itemsize):
    x_tiles = 2 * tb * input_dim * in_itemsize      # double-buffered x tile
    out_tiles = 2 * tb * output_dim * 4             # double-buffered out tile
    hidden = 2 * tb * _LANE * 4                     # h1 / h2 intermediates
    weights = 2 * 4 * (input_dim * _H1 + _H1 + _H1 * _LANE + _LANE
                       + _LANE * output_dim + output_dim)
    need = 2 * (x_tiles + out_tiles + hidden + weights)   # 2x safety margin
    return int(min(max(need, 32 << 20), 48 << 20))


def oracle_imitation_forward(x, params, *, tb=2048, compute_dtype=jnp.float32):
    """Fused MLP forward.

    x: (B, input_dim).  Output dtype follows x.dtype (f32 in the PyTorch contract).
    params: dict of w1,b1,w2,b2,w3,b3 with w: (in, out), b: (1, out).
    tb: batch tile; sweep 1024-4096 for very large B. Clamped so the grid has
        >=2 steps whenever B allows it (feeds both v7x TensorCores).
    compute_dtype: jnp.float32 (default, exact parity) or jnp.bfloat16
        (only worth it when input_dim is large enough to be MXU-bound).
    """
    B, input_dim = x.shape
    out_dtype = x.dtype

    w1 = _maybe_cast(params["w1"], compute_dtype)
    b1 = _maybe_cast(params["b1"], jnp.float32)
    w2 = params["w2"]
    b2 = params["b2"]
    w3 = params["w3"]
    b3 = params["b3"]
    output_dim = w3.shape[1]

    # Lane-dense hidden layer 2: pad 64 -> 128. Numerically identical.
    if w2.shape[1] != _LANE:
        pad = _LANE - w2.shape[1]
        w2 = jnp.pad(w2, ((0, 0), (0, pad)))
        b2 = jnp.pad(b2, ((0, 0), (0, pad)))
        w3 = jnp.pad(w3, ((0, pad), (0, 0)))
    w2 = _maybe_cast(w2, compute_dtype)
    b2 = _maybe_cast(b2, jnp.float32)
    w3 = _maybe_cast(w3, compute_dtype)
    b3 = _maybe_cast(b3, jnp.float32)

    # Batch tile: multiple of the sublane packing, and capped so that modest
    # batches still produce >= 2 grid steps (megacore sharding on v7x).
    sub = _SUBLANE_BF16 if compute_dtype == jnp.bfloat16 else _SUBLANE_F32
    tb = _round_up(max(int(tb), sub), sub)
    if B > 2 * sub:
        tb = min(tb, _round_up(_cdiv(B, 2), sub))
    else:
        tb = min(tb, _round_up(B, sub))

    grid = (_cdiv(B, tb),)   # ragged last tile handled by Pallas (masked writeback)

    # Weights/biases: constant block index across the grid -> resident in VMEM,
    # no per-step re-DMA (Mosaic skips the copy when the block index repeats).
    def rep(a):
        return pl.BlockSpec(a.shape, lambda i: (0, 0))

    out = pl.pallas_call(
        _mlp_kernel,
        out_shape=jax.ShapeDtypeStruct((B, output_dim), out_dtype),
        grid_spec=pltpu.PrefetchScalarGridSpec(
            num_scalar_prefetch=0,
            grid=grid,
            in_specs=[
                pl.BlockSpec((tb, input_dim), lambda i: (i, 0)),  # streamed x tile
                rep(w1), rep(b1),
                rep(w2), rep(b2),
                rep(w3), rep(b3),
            ],
            # Narrow (output_dim-wide) output block: last dim equals the full
            # array dim, so masked stores are used but HBM writes are 8x
            # smaller than a 128-padded slab (and no wrapper slice pass).
            out_specs=pl.BlockSpec((tb, output_dim), lambda i: (i, 0)),
        ),
        compiler_params=pltpu.CompilerParams(
            dimension_semantics=("parallel",),   # megacore shards batch tiles
            vmem_limit_bytes=_derive_vmem_limit(tb, input_dim, output_dim,
                                                x.dtype.itemsize),
        ),
    )(x, w1, b1, w2, b2, w3, b3)

    return out


def oracle_imitation_apply(x, params, *, min_pallas_batch=64, **kw):
    """Dispatch: trivially small batches go to plain XLA (kernel overhead dominates)."""
    if x.shape[0] < min_pallas_batch:
        return reference_forward(x, params)
    return oracle_imitation_forward(x, params, **kw)


def init_params(key, input_dim, output_dim):
    """Deterministic synthetic init (PyTorch-like uniform fan-in scaling)."""
    ks = jax.random.split(key, 6)

    def linear(kw, kb, fan_in, fan_out):
        bound = 1.0 / jnp.sqrt(fan_in)
        w = jax.random.uniform(kw, (fan_in, fan_out), jnp.float32, -bound, bound)
        b = jax.random.uniform(kb, (1, fan_out), jnp.float32, -bound, bound)
        return w, b

    w1, b1 = linear(ks[0], ks[1], input_dim, _H1)
    w2, b2 = linear(ks[2], ks[3], _H1, _H2)
    w3, b3 = linear(ks[4], ks[5], _H2, output_dim)
    return {"w1": w1, "b1": b1, "w2": w2, "b2": b2, "w3": w3, "b3": b3}


def reference_forward(x, p):
    """Pure f32 reference (matches the PyTorch module numerically)."""
    hp = jax.lax.Precision.HIGHEST
    h = jnp.maximum(jnp.dot(x, p["w1"], precision=hp) + p["b1"], 0.0)
    h = jnp.maximum(jnp.dot(h, p["w2"], precision=hp) + p["b2"], 0.0)
    return jnp.dot(h, p["w3"], precision=hp) + p["b3"]


if __name__ == "__main__":
    key = jax.random.PRNGKey(0)
    k_x, k_p = jax.random.split(key)

    # Small but non-trivial shapes: batch is NOT a multiple of the tile, so the
    # multi-step grid with a ragged (masked-writeback) final tile is exercised,
    # along with the hidden-layer 64->128 padding and narrow output block.
    batch = 200
    input_dim = 32
    output_dim = 16

    x = jax.random.normal(k_x, (batch, input_dim), jnp.float32)
    params = init_params(k_p, input_dim, output_dim)

    out = oracle_imitation_forward(x, params)   # tb auto-capped -> 2 grid steps
    out = jax.block_until_ready(out)
    assert out.shape == (batch, output_dim)

    # f32 end-to-end kernel vs. highest-precision f32 reference.
    ref = reference_forward(x, params)
    assert jnp.allclose(out, ref, atol=2e-2, rtol=2e-2)

    print("KERNEL_OK")
</pallas_src>

<mosaic_0001>
module attributes {stable_mosaic.version = 11 : i64} {
  func.func @_mlp_kernel(%arg0: i32, %arg1: memref<104x32xf32, #tpu.memory_space<vmem>>, %arg2: memref<32x128xf32, #tpu.memory_space<vmem>>, %arg3: memref<1x128xf32, #tpu.memory_space<vmem>>, %arg4: memref<128x128xf32, #tpu.memory_space<vmem>>, %arg5: memref<1x128xf32, #tpu.memory_space<vmem>>, %arg6: memref<128x16xf32, #tpu.memory_space<vmem>>, %arg7: memref<1x16xf32, #tpu.memory_space<vmem>>, %arg8: memref<104x16xf32, #tpu.memory_space<vmem>>) attributes {dimension_semantics = [#tpu.dimension_semantics<parallel>], iteration_bounds = array<i64: 2>, scalar_prefetch = 0 : i64, scratch_operands = 0 : i64, tpu.core_type = #tpu.core_type<tc>, window_params = [{transform_indices = @transform_0, window_bounds = array<i64: 104, 32>}, {pipeline_mode = #tpu.pipeline_mode<synchronous>, transform_indices = @transform_1, window_bounds = array<i64: 32, 128>}, {pipeline_mode = #tpu.pipeline_mode<synchronous>, transform_indices = @transform_2, window_bounds = array<i64: 1, 128>}, {pipeline_mode = #tpu.pipeline_mode<synchronous>, transform_indices = @transform_3, window_bounds = array<i64: 128, 128>}, {pipeline_mode = #tpu.pipeline_mode<synchronous>, transform_indices = @transform_4, window_bounds = array<i64: 1, 128>}, {pipeline_mode = #tpu.pipeline_mode<synchronous>, transform_indices = @transform_5, window_bounds = array<i64: 128, 16>}, {pipeline_mode = #tpu.pipeline_mode<synchronous>, transform_indices = @transform_6, window_bounds = array<i64: 1, 16>}, {transform_indices = @transform_7, window_bounds = array<i64: 104, 16>}]} {
    %c0 = arith.constant 0 : index
    %c0_0 = arith.constant 0 : index
    %0 = vector.load %arg1[%c0, %c0_0] : memref<104x32xf32, #tpu.memory_space<vmem>>, vector<104x32xf32>
    %c0_1 = arith.constant 0 : index
    %c0_2 = arith.constant 0 : index
    %1 = vector.load %arg2[%c0_1, %c0_2] : memref<32x128xf32, #tpu.memory_space<vmem>>, vector<32x128xf32>
    %cst = arith.constant dense<0.000000e+00> : vector<104x128xf32>
    %2 = tpu.matmul %0, %1, %cst {dimension_numbers = #tpu.dot_dimension_numbers<[1], [0], [0], [1], [0, 0, 1, 1], [], []>} : vector<104x32xf32>, vector<32x128xf32>, vector<104x128xf32> -> vector<104x128xf32>
    %c0_3 = arith.constant 0 : index
    %c0_4 = arith.constant 0 : index
    %3 = vector.load %arg3[%c0_3, %c0_4] : memref<1x128xf32, #tpu.memory_space<vmem>>, vector<1x128xf32>
    %4 = vector.broadcast %3 : vector<1x128xf32> to vector<104x128xf32>
    %5 = arith.addf %2, %4 : vector<104x128xf32>
    %cst_5 = arith.constant 0.000000e+00 : f32
    %6 = vector.broadcast %cst_5 : f32 to vector<104x128xf32>
    %7 = arith.maximumf %5, %6 : vector<104x128xf32>
    %c0_6 = arith.constant 0 : index
    %c0_7 = arith.constant 0 : index
    %8 = vector.load %arg4[%c0_6, %c0_7] : memref<128x128xf32, #tpu.memory_space<vmem>>, vector<128x128xf32>
    %cst_8 = arith.constant dense<0.000000e+00> : vector<104x128xf32>
    %9 = tpu.matmul %7, %8, %cst_8 {dimension_numbers = #tpu.dot_dimension_numbers<[1], [0], [0], [1], [0, 0, 1, 1], [], []>} : vector<104x128xf32>, vector<128x128xf32>, vector<104x128xf32> -> vector<104x128xf32>
    %c0_9 = arith.constant 0 : index
    %c0_10 = arith.constant 0 : index
    %10 = vector.load %arg5[%c0_9, %c0_10] : memref<1x128xf32, #tpu.memory_space<vmem>>, vector<1x128xf32>
    %11 = vector.broadcast %10 : vector<1x128xf32> to vector<104x128xf32>
    %12 = arith.addf %9, %11 : vector<104x128xf32>
    %cst_11 = arith.constant 0.000000e+00 : f32
    %13 = vector.broadcast %cst_11 : f32 to vector<104x128xf32>
    %14 = arith.maximumf %12, %13 : vector<104x128xf32>
    %c0_12 = arith.constant 0 : index
    %c0_13 = arith.constant 0 : index
    %15 = vector.load %arg6[%c0_12, %c0_13] : memref<128x16xf32, #tpu.memory_space<vmem>>, vector<128x16xf32>
    %cst_14 = arith.constant dense<0.000000e+00> : vector<104x16xf32>
    %16 = tpu.matmul %14, %15, %cst_14 {dimension_numbers = #tpu.dot_dimension_numbers<[1], [0], [0], [1], [0, 0, 1, 1], [], []>} : vector<104x128xf32>, vector<128x16xf32>, vector<104x16xf32> -> vector<104x16xf32>
    %c0_15 = arith.constant 0 : index
    %c0_16 = arith.constant 0 : index
    %17 = vector.load %arg7[%c0_15, %c0_16] : memref<1x16xf32, #tpu.memory_space<vmem>>, vector<1x16xf32>
    %18 = vector.broadcast %17 : vector<1x16xf32> to vector<104x16xf32>
    %19 = arith.addf %16, %18 : vector<104x16xf32>
    %c0_17 = arith.constant 0 : index
    %c0_18 = arith.constant 0 : index
    %20 = vector.load %arg8[%c0_17, %c0_18] : memref<104x16xf32, #tpu.memory_space<vmem>>, vector<104x16xf32>
    tpu.vector_store %arg8[%c0_17, %c0_18], %19 {strides = array<i32>} : memref<104x16xf32, #tpu.memory_space<vmem>>, vector<104x16xf32>,
    return
  }
  func.func @transform_0(%arg0: i32) -> (i32, i32) {
    %c0_i32 = arith.constant 0 : i32
    %c0_i32_0 = arith.constant 0 : i32
    return %arg0, %c0_i32 : i32, i32
  }
  func.func @transform_1(%arg0: i32) -> (i32, i32) {
    %c0_i32 = arith.constant 0 : i32
    %c0_i32_0 = arith.constant 0 : i32
    %c0_i32_1 = arith.constant 0 : i32
    return %c0_i32, %c0_i32_0 : i32, i32
  }
  func.func @transform_2(%arg0: i32) -> (i32, i32) {
    %c0_i32 = arith.constant 0 : i32
    %c0_i32_0 = arith.constant 0 : i32
    %c0_i32_1 = arith.constant 0 : i32
    return %c0_i32, %c0_i32_0 : i32, i32
  }
  func.func @transform_3(%arg0: i32) -> (i32, i32) {
    %c0_i32 = arith.constant 0 : i32
    %c0_i32_0 = arith.constant 0 : i32
    %c0_i32_1 = arith.constant 0 : i32
    return %c0_i32, %c0_i32_0 : i32, i32
  }
  func.func @transform_4(%arg0: i32) -> (i32, i32) {
    %c0_i32 = arith.constant 0 : i32
    %c0_i32_0 = arith.constant 0 : i32
    %c0_i32_1 = arith.constant 0 : i32
    return %c0_i32, %c0_i32_0 : i32, i32
  }
  func.func @transform_5(%arg0: i32) -> (i32, i32) {
    %c0_i32 = arith.constant 0 : i32
    %c0_i32_0 = arith.constant 0 : i32
    %c0_i32_1 = arith.constant 0 : i32
    return %c0_i32, %c0_i32_0 : i32, i32
  }
  func.func @transform_6(%arg0: i32) -> (i32, i32) {
    %c0_i32 = arith.constant 0 : i32
    %c0_i32_0 = arith.constant 0 : i32
    %c0_i32_1 = arith.constant 0 : i32
    return %c0_i32, %c0_i32_0 : i32, i32
  }
  func.func @transform_7(%arg0: i32) -> (i32, i32) {
    %c0_i32 = arith.constant 0 : i32
    %c0_i32_0 = arith.constant 0 : i32
    return %arg0, %c0_i32 : i32, i32
  }
}

</mosaic_0001>

<bundles_post_ra>
// kernel: tpu_custom_call.1
= control target key start
LH: loop header
LB: loop body
LE: loop exit
PB: predicated region body
PF: predicated region fallthrough
CT: control target
= control target key end

     0   :  { %s1165_s24 = smov 0   ;;  %s1167_s25 = smov 0   ;;  %s1484_s0 = inlined_call_operand.vmem [shape: f32[200,32], index: 0, kind: input, shape index: {}]   ;;  %s1485_s1 = inlined_call_operand.vmem [shape: f32[32,128], index: 1, kind: input, shape index: {}]   ;;  %s1486_s2 = inlined_call_operand.vmem [shape: f32[1,128], index: 2, kind: input, shape index: {}]   ;;  %s1487_s3 = inlined_call_operand.vmem [shape: f32[128,128], index: 3, kind: input, shape index: {}]   ;;  %s1488_s4 = inlined_call_operand.vmem [shape: f32[1,128], index: 4, kind: input, shape index: {}]   ;;  %s1489_s5 = inlined_call_operand.vmem [shape: f32[128,16], index: 5, kind: input, shape index: {}]   ;;  %s1490_s6 = inlined_call_operand.vmem [shape: f32[1,16], index: 6, kind: input, shape index: {}]   ;;  %s1491_s7 = inlined_call_operand.vmem [shape: f32[200,16], index: 7, kind: output, shape index: {}]  }
   0x1   :  { %s1169_s26 = smov 0  }
   0x2 LB: > { %s1178_s27 = sadd.s32 4294967295, %s1091_s26   ;;  %s1180_s28 = sadd.s32 1, %s1091_s26   ;;  %s1091_s26 = sphi %s1169_s26, %s1500_s26   ;;  %s1087_s25 = sphi %s1167_s25, %s1499_s25   ;;  %s1083_s24 = sphi %s1165_s24, %s1498_s24  }
   0x3   : > { %s173_s29 = ssub.s32 %s1091_s26, %s1180_s28  ;;  %s176_s30 = sadd.s32 1, %s1087_s25 }
   0x4   : > { %p174_p0 = scmp.eq.s32.totalorder %s173_s29, 0  ;;  %p186_p1 = scmp.ne.s32.totalorder %s1087_s25, %s1083_s24 }
   0x5   : > { %p187_p2 = scmp.eq.s32.totalorder %s1178_s27, 1  ;;  %p878_p3 = scmp.ge.s32.totalorder %s1091_s26, 1 }
   0x6   : > { %s1188_s8 = scalar_select %p174_p0, %s1087_s25, %s176_s30  }
   0x7   : > { %p1190_p4 = por %p187_p2, %p186_p1  ;;  %p246_p5 = scmp.lt.s32.totalorder %s1091_s26, 3 }
   0x9   : > { %p247_p6 = pnand %p878_p3, %p246_p5 }
   0xa   : > { %s1201_s14 = smul.u32 (!%p247_p6), 13, %s1178_s27  ;;  %s278_s12 = sand.u32 (!%p247_p6), 1, %s1083_s24  }
   0xb   : > { %250 = sbr.rel (%p247_p6) target bundleno = 581 (0x245), region = 48 }
   0xc   : > { %p286_p7 = scmp.lt.s32.totalorder (!%p247_p6), %s1201_s14, 24  ;;  %s938_s13 = smul.u32 (!%p247_p6), 104, %s278_s12 }
   0xe   : > { %s1363_s17 = scalar_lea.vmem (!%p247_p6), [#allocation2], %s938_s13  }
  0x10   : > { %v316_v0 = vld [vmem:[%s1485_s1 + $0x18] sm:$0xff]  ;;  %v315_v1 = vld [vmem:[%s1485_s1 + $0x10] sm:$0xff]  ;;  %v314_v2 = vld [vmem:[%s1485_s1 + $0x8] sm:$0xff]  ;;  %s287_s19 = scalar_select %p286_p7, %s1201_s14, 24  ;;  %vm321_vm0 = vcmask 261120   ;;  %vm595_vm1 = vcmask 130048  }
  0x11   : > { %373 = vmatpush.msra.mxu0 %v316_v0  ;;  %v313_v3 = vld [vmem:[%s1485_s1] sm:$0xff]  ;;  %v445_v13 = vld [vmem:[%s1487_s3 + $0x78] sm:$0xff]  ;;  %v444_v14 = vld [vmem:[%s1487_s3 + $0x70] sm:$0xff]  ;;  %s617_s24 = ssub.s32 (%p1190_p4), 25, %s1201_s14  ;;  %s905_s18 = smul.u32 (%p1190_p4), 104, %s1178_s27 }
  0x12   : > { %s879_s20 = sshll.u32 %s287_s19, 3  ;;  %450 = vmatpush.msra.mxu1 %v445_v13  ;;  %906 = vmatpush.msra.mxu3 %v445_v13  ;;  %v443_v15 = vld [vmem:[%s1487_s3 + $0x68] sm:$0xff]  ;;  %v442_v16 = vld [vmem:[%s1487_s3 + $0x60] sm:$0xff]  ;;  %v441_v18 = vld [vmem:[%s1487_s3 + $0x58] sm:$0xff]  ;;  %p618_p8 = scmp.lt.s32.totalorder (%p1190_p4), %s617_s24, 13 }
  0x13   : > { %374 = vmatpush.msra.mxu0 %v315_v1  ;;  %s1214_s23 = scalar_lea.vmem %s1484_s0, %s879_s20  ;;  %v440_v19 = vld [vmem:[%s1487_s3 + $0x50] sm:$0xff]  ;;  %v439_v20 = vld [vmem:[%s1487_s3 + $0x48] sm:$0xff]  ;;  %v438_v21 = vld [vmem:[%s1487_s3 + $0x40] sm:$0xff]  ;;  %s1398_s21 = scalar_lea.vmem (%p1190_p4), %s1491_s7, %s905_s18  }
  0x14   : > { %v300_v4 = vld [vmem:[%s1214_s23] sm:$0xff]  ;;  %v301_v5 = vld [vmem:[%s1214_s23 + $0x8] sm:$0xff]  ;;  %v302_v6 = vld [vmem:[%s1214_s23 + $0x10] sm:$0xff]  ;;  %451 = vmatpush.msra.mxu1 %v444_v14  ;;  %907 = vmatpush.msra.mxu3 %v444_v14 }
  0x15   : > { %375 = vmatpush.msra.mxu0 %v314_v2  ;;  %v303_v7 = vld [vmem:[%s1214_s23 + $0x18] sm:$0xff]  ;;  %v304_v8 = vld [vmem:[%s1214_s23 + $0x20] sm:$0xff]  ;;  %v305_v9 = vld [vmem:[%s1214_s23 + $0x28] sm:$0xff] }
  0x16   : > { %v306_v10 = vld [vmem:[%s1214_s23 + $0x30] sm:$0xff]  ;;  %v307_v11 = vld [vmem:[%s1214_s23 + $0x38] sm:$0xff]  ;;  %v308_v12 = vld [vmem:[%s1214_s23 + $0x40] sm:$0xff]  ;;  %452 = vmatpush.msra.mxu1 %v443_v15  ;;  %908 = vmatpush.msra.mxu3 %v443_v15 }
  0x17   : > { %376 = vmatpush.msra.mxu0 %v313_v3  ;;  %v309_v17 = vld [vmem:[%s1214_s23 + $0x48] sm:$0xff]  ;;  %v310_v22 = vld [vmem:[%s1214_s23 + $0x50] sm:$0xff]  ;;  %v437_v23 = vld [vmem:[%s1487_s3 + $0x38] sm:$0xff] }
  0x18   : > { %880 = vmatmul.msk.f32.vlgmr.msra.gmra.mxu0 %vm321_vm0, %v300_v4  ;;  %453 = vmatpush.msra.mxu1 %v442_v16  ;;  %v436_v24 = vld [vmem:[%s1487_s3 + $0x30] sm:$0xff]  ;;  %v435_v25 = vld [vmem:[%s1487_s3 + $0x28] sm:$0xff]  ;;  %v434_v26 = vld [vmem:[%s1487_s3 + $0x20] sm:$0xff] }
  0x19   : > { %909 = vmatpush.msra.mxu3 %v442_v16  ;;  %v311_v27 = vld [vmem:[%s1214_s23 + $0x58] sm:$0xff]  ;;  %v432_v29 = vld [vmem:[%s1487_s3 + $0x10] sm:$0xff]  ;;  %v312_v30 = vld [vmem:[%s1214_s23 + $0x60] sm:$0xff] }
  0x1a   : > { %454 = vmatpush.msra.mxu1 %v441_v18  ;;  %v433_v28 = vld [vmem:[%s1487_s3 + $0x18] sm:$0xff]  ;;  %v431_v31 = vld [vmem:[%s1487_s3 + $0x8] sm:$0xff]  ;;  %v430_v32 = vld [vmem:[%s1487_s3] sm:$0xff] }
  0x1b   : > { %910 = vmatpush.msra.mxu3 %v441_v18  ;;  %v1293_v33 = vld [vmem:[%s1486_s2] ss:$0 sm:$0xff]  ;;  %v534_v61 = vld [vmem:[%s1489_s5 + $0x78] sm:$0xff]  ;;  %v533_v62 = vld [vmem:[%s1489_s5 + $0x70] sm:$0xff] }
  0x1c   : > { %455 = vmatpush.msra.mxu1 %v440_v19  ;;  %539 = vmatpush.msra.mxu2 %v534_v61  ;;  %v532_v63 = vld [vmem:[%s1489_s5 + $0x68] sm:$0xff]  ;;  %v531_v2 = vld [vmem:[%s1489_s5 + $0x60] sm:$0xff]  ;;  %v530_v4 = vld [vmem:[%s1489_s5 + $0x58] sm:$0xff] }
  0x1d   : > { %911 = vmatpush.msra.mxu3 %v440_v19  ;;  %v524_v13 = vld [vmem:[%s1489_s5 + $0x28] sm:$0xff]  ;;  %v523_v16 = vld [vmem:[%s1489_s5 + $0x20] sm:$0xff]  ;;  %v522_v18 = vld [vmem:[%s1489_s5 + $0x18] sm:$0xff] }
  0x1e   : > { %456 = vmatpush.msra.mxu1 %v439_v20  ;;  %540 = vmatpush.msra.mxu2 %v533_v62 }
  0x1f   : > { %912 = vmatpush.msra.mxu3 %v439_v20 }
  0x20   : > { %881 = vmatmul.msk.f32.gmra.mxu0 %vm321_vm0, %v301_v5  ;;  %457 = vmatpush.msra.mxu1 %v438_v21  ;;  %v529_v5 = vld [vmem:[%s1489_s5 + $0x50] sm:$0xff] }
  0x21   : > { %913 = vmatpush.msra.mxu3 %v438_v21  ;;  %541 = vmatpush.msra.mxu2 %v532_v63  ;;  %v521_v21 = vld [vmem:[%s1489_s5 + $0x10] sm:$0xff] }
  0x22   : > { %458 = vmatpush.msra.mxu1 %v437_v23 }
  0x23   : > { %914 = vmatpush.msra.mxu3 %v437_v23  ;;  %542 = vmatpush.msra.mxu2 %v531_v2  ;;  %v520_v23 = vld [vmem:[%s1489_s5 + $0x8] sm:$0xff] }
  0x24   : > { %459 = vmatpush.msra.mxu1 %v436_v24 }
  0x25   : > { %915 = vmatpush.msra.mxu3 %v436_v24  ;;  %543 = vmatpush.msra.mxu2 %v530_v4  ;;  %v519_v24 = vld [vmem:[%s1489_s5] sm:$0xff] }
  0x26   : > { %460 = vmatpush.msra.mxu1 %v435_v25 }
  0x27   : > { %916 = vmatpush.msra.mxu3 %v435_v25  ;;  %544 = vmatpush.msra.mxu2 %v529_v5  ;;  %v1029_v25 = vld [vmem:[%s1488_s4] ss:$0 sm:$0xff] }
  0x28   : > { %882 = vmatmul.msk.f32.gmra.mxu0 %vm321_vm0, %v302_v6  ;;  %461 = vmatpush.msra.mxu1 %v434_v26  ;;  %v528_v6 = vld [vmem:[%s1489_s5 + $0x48] sm:$0xff] }
  0x29   : > { %917 = vmatpush.msra.mxu3 %v434_v26  ;;  %545 = vmatpush.msra.mxu2 %v528_v6 }
  0x2a   : > { %462 = vmatpush.msra.mxu1 %v433_v28 }
  0x2b   : > { %918 = vmatpush.msra.mxu3 %v433_v28 }
  0x2c   : > { %463 = vmatpush.msra.mxu1 %v432_v29 }
  0x2d   : > { %919 = vmatpush.msra.mxu3 %v432_v29 }
  0x2e   : > { %464 = vmatpush.msra.mxu1 %v431_v31 }
  0x2f   : > { %920 = vmatpush.msra.mxu3 %v431_v31 }
  0x30   : > { %883 = vmatmul.msk.f32.gmra.mxu0 %vm321_vm0, %v303_v7  ;;  %465 = vmatpush.msra.mxu1 %v430_v32 }
  0x31   : > { %921 = vmatpush.msra.mxu3 %v430_v32 }
  0x33   : > { %922 = vmatpush.msrb.mxu3 %v534_v61 }
  0x35   : > { %923 = vmatpush.msrb.mxu3 %v533_v62 }
  0x37   : > { %924 = vmatpush.msrb.mxu3 %v532_v63 }
  0x38   : > { %884 = vmatmul.msk.f32.gmra.mxu0 %vm321_vm0, %v304_v8 }
  0x39   : > { %925 = vmatpush.msrb.mxu3 %v531_v2 }
  0x3b   : > { %926 = vmatpush.msrb.mxu3 %v530_v4 }
  0x3d   : > { %927 = vmatpush.msrb.mxu3 %v529_v5 }
  0x3f   : > { %928 = vmatpush.msrb.mxu3 %v528_v6 }
  0x40   : > { %885 = vmatmul.msk.f32.gmra.mxu0 %vm321_vm0, %v305_v9  ;;  %v527_v9 = vld [vmem:[%s1489_s5 + $0x40] sm:$0xff] }
  0x41   : > { %546 = vmatpush.msra.mxu2 %v527_v9  ;;  %929 = vmatpush.msrb.mxu3 %v527_v9 }
  0x48   : > { %886 = vmatmul.msk.f32.gmra.mxu0 %vm321_vm0, %v306_v10 }
  0x50   : > { %887 = vmatmul.msk.f32.gmra.mxu0 %vm321_vm0, %v307_v11  ;;  %v526_v11 = vld [vmem:[%s1489_s5 + $0x38] sm:$0xff] }
  0x51   : > { %547 = vmatpush.msra.mxu2 %v526_v11  ;;  %930 = vmatpush.msrb.mxu3 %v526_v11 }
  0x58   : > { %888 = vmatmul.msk.f32.gmra.mxu0 %vm321_vm0, %v308_v12  ;;  %v525_v12 = vld [vmem:[%s1489_s5 + $0x30] sm:$0xff] }
  0x59   : > { %548 = vmatpush.msra.mxu2 %v525_v12  ;;  %931 = vmatpush.msrb.mxu3 %v525_v12 }
  0x5b   : > { %549 = vmatpush.msra.mxu2 %v524_v13  ;;  %932 = vmatpush.msrb.mxu3 %v524_v13 }
  0x5d   : > { %550 = vmatpush.msra.mxu2 %v523_v16  ;;  %933 = vmatpush.msrb.mxu3 %v523_v16 }
  0x5f   : > { %551 = vmatpush.msra.mxu2 %v522_v18  ;;  %934 = vmatpush.msrb.mxu3 %v522_v18 }
  0x60   : > { %889 = vmatmul.msk.f32.gmra.mxu0 %vm321_vm0, %v309_v17 }
  0x61   : > { %552 = vmatpush.msra.mxu2 %v521_v21  ;;  %935 = vmatpush.msrb.mxu3 %v521_v21 }
  0x63   : > { %553 = vmatpush.msra.mxu2 %v520_v23  ;;  %936 = vmatpush.msrb.mxu3 %v520_v23 }
  0x65   : > { %554 = vmatpush.msra.mxu2 %v519_v24  ;;  %937 = vmatpush.msrb.mxu3 %v519_v24 }
  0x68   : > { %890 = vmatmul.msk.f32.gmra.mxu0 %vm321_vm0, %v310_v22 }
  0x70   : > { %891 = vmatmul.msk.f32.gmra.mxu0 %vm321_vm0, %v311_v27 }
  0x78   : > { %892 = vmatmul.msk.f32.gmra.mxu0 %vm321_vm0, %v312_v30 }
  0x95   : > { %v378_v34 = vpop.f32.mrf.mxu0 }
  0x96   : > { %v379_v35 = vadd.f32 %v1293_v33, %v378_v34 }
  0x98   : > { %v417_v36 = vmax.f32 %v379_v35, 0.0 }
  0x9a   : > { %466 = vmatmul.f32.vlgmr.msra.gmra.mxu1 %v417_v36 }
  0x9d   : > { %v381_v37 = vpop.f32.mrf.mxu0 }
  0x9e   : > { %v382_v38 = vadd.f32 %v1293_v33, %v381_v37 }
  0xa0   : > { %v418_v39 = vmax.f32 %v382_v38, 0.0 }
  0xa2   : > { %469 = vmatmul.f32.gmra.mxu1 %v418_v39 }
  0xa5   : > { %v384_v40 = vpop.f32.mrf.mxu0 }
  0xa6   : > { %v385_v41 = vadd.f32 %v1293_v33, %v384_v40 }
  0xa8   : > { %v419_v42 = vmax.f32 %v385_v41, 0.0 }
  0xaa   : > { %472 = vmatmul.f32.gmra.mxu1 %v419_v42 }
  0xad   : > { %v387_v43 = vpop.f32.mrf.mxu0 }
  0xae   : > { %v388_v44 = vadd.f32 %v1293_v33, %v387_v43 }
  0xb0   : > { %v420_v45 = vmax.f32 %v388_v44, 0.0 }
  0xb2   : > { %475 = vmatmul.f32.gmra.mxu1 %v420_v45 }
  0xb5   : > { %v390_v46 = vpop.f32.mrf.mxu0 }
  0xb6   : > { %v391_v47 = vadd.f32 %v1293_v33, %v390_v46 }
  0xb8   : > { %v421_v48 = vmax.f32 %v391_v47, 0.0 }
  0xba   : > { %478 = vmatmul.f32.gmra.mxu1 %v421_v48 }
  0xbd   : > { %v393_v49 = vpop.f32.mrf.mxu0 }
  0xbe   : > { %v394_v50 = vadd.f32 %v1293_v33, %v393_v49 }
  0xc0   : > { %v422_v51 = vmax.f32 %v394_v50, 0.0 }
  0xc2   : > { %481 = vmatmul.f32.gmra.mxu1 %v422_v51 }
  0xc5   : > { %v396_v52 = vpop.f32.mrf.mxu0 }
  0xc6   : > { %v397_v53 = vadd.f32 %v1293_v33, %v396_v52 }
  0xc8   : > { %v423_v54 = vmax.f32 %v397_v53, 0.0 }
  0xca   : > { %484 = vmatmul.f32.gmra.mxu1 %v423_v54 }
  0xcd   : > { %v399_v55 = vpop.f32.mrf.mxu0 }
  0xce   : > { %v400_v56 = vadd.f32 %v1293_v33, %v399_v55 }
  0xd0   : > { %v424_v57 = vmax.f32 %v400_v56, 0.0 }
  0xd2   : > { %487 = vmatmul.f32.gmra.mxu1 %v424_v57 }
  0xd5   : > { %v402_v58 = vpop.f32.mrf.mxu0 }
  0xd6   : > { %v403_v59 = vadd.f32 %v1293_v33, %v402_v58 }
  0xd8   : > { %v425_v60 = vmax.f32 %v403_v59, 0.0 }
  0xda   : > { %490 = vmatmul.f32.gmra.mxu1 %v425_v60 }
  0xdd   : > { %v405_v0 = vpop.f32.mrf.mxu0 }
  0xde   : > { %v406_v1 = vadd.f32 %v1293_v33, %v405_v0 }
  0xe0   : > { %v426_v3 = vmax.f32 %v406_v1, 0.0  ;;  %v1030_v1 = vld [vmem:[%s1490_s6] ss:$0 sm:$0xff] }
  0xe2   : > { %493 = vmatmul.f32.vlgmr.msra.gmra.mxu3 %v426_v3 }
  0xe5   : > { %v408_v7 = vpop.f32.mrf.mxu0 }
  0xe6   : > { %v409_v8 = vadd.f32 %v1293_v33, %v408_v7 }
  0xe8   : > { %v427_v10 = vmax.f32 %v409_v8, 0.0 }
  0xea   : > { %496 = vmatmul.f32.gmra.mxu3 %v427_v10 }
  0xed   : > { %v411_v14 = vpop.f32.mrf.mxu0 }
  0xee   : > { %v412_v15 = vadd.f32 %v1293_v33, %v411_v14 }
  0xf0   : > { %v428_v17 = vmax.f32 %v412_v15, 0.0 }
  0xf2   : > { %499 = vmatmul.f32.gmra.mxu3 %v428_v17 }
  0xf5   : > { %v414_v19 = vpop.f32.mrf.mxu0 }
  0xf6   : > { %v415_v20 = vadd.f32 %v1293_v33, %v414_v19 }
  0xf8   : > { %v429_v22 = vmax.f32 %v415_v20, 0.0 }
  0xfa   : > { %502 = vmatmul.f32.gmra.mxu3 %v429_v22 }
 0x117   : > { %v467_v26 = vpop.f32.mrf.mxu1 }
 0x118   : > { %v468_v27 = vadd.f32 %v1029_v25, %v467_v26 }
 0x11a   : > { %v506_v28 = vmax.f32 %v468_v27, 0.0 }
 0x11c   : > { %555 = vmatmul.f32.vlgmr.msra.gmra.mxu2 %v506_v28 }
 0x11f   : > { %v470_v29 = vpop.f32.mrf.mxu1 }
 0x120   : > { %v471_v30 = vadd.f32 %v1029_v25, %v470_v29 }
 0x122   : > { %v507_v31 = vmax.f32 %v471_v30, 0.0 }
 0x124   : > { %558 = vmatmul.f32.gmra.mxu2 %v507_v31 }
 0x127   : > { %v473_v32 = vpop.f32.mrf.mxu1 }
 0x128   : > { %v474_v33 = vadd.f32 %v1029_v25, %v473_v32 }
 0x12a   : > { %v508_v34 = vmax.f32 %v474_v33, 0.0 }
 0x12c   : > { %561 = vmatmul.f32.gmra.mxu2 %v508_v34 }
 0x12f   : > { %v476_v35 = vpop.f32.mrf.mxu1 }
 0x130   : > { %v477_v36 = vadd.f32 %v1029_v25, %v476_v35 }
 0x132   : > { %v509_v37 = vmax.f32 %v477_v36, 0.0 }
 0x134   : > { %564 = vmatmul.f32.gmra.mxu2 %v509_v37 }
 0x137   : > { %v479_v38 = vpop.f32.mrf.mxu1 }
 0x138   : > { %v480_v39 = vadd.f32 %v1029_v25, %v479_v38 }
 0x13a   : > { %v510_v40 = vmax.f32 %v480_v39, 0.0 }
 0x13c   : > { %567 = vmatmul.f32.gmra.mxu2 %v510_v40 }
 0x13f   : > { %v482_v41 = vpop.f32.mrf.mxu1 }
 0x140   : > { %v483_v42 = vadd.f32 %v1029_v25, %v482_v41 }
 0x142   : > { %v511_v43 = vmax.f32 %v483_v42, 0.0 }
 0x144   : > { %570 = vmatmul.f32.gmra.mxu2 %v511_v43 }
 0x147   : > { %v485_v44 = vpop.f32.mrf.mxu1 }
 0x148   : > { %v486_v45 = vadd.f32 %v1029_v25, %v485_v44 }
 0x14a   : > { %v512_v46 = vmax.f32 %v486_v45, 0.0 }
 0x14c   : > { %573 = vmatmul.f32.gmra.mxu2 %v512_v46 }
 0x14f   : > { %v488_v47 = vpop.f32.mrf.mxu1 }
 0x150   : > { %v489_v48 = vadd.f32 %v1029_v25, %v488_v47 }
 0x152   : > { %v513_v49 = vmax.f32 %v489_v48, 0.0 }
 0x154   : > { %576 = vmatmul.f32.gmra.mxu2 %v513_v49 }
 0x157   : > { %v491_v50 = vpop.f32.mrf.mxu1 }
 0x158   : > { %v492_v51 = vadd.f32 %v1029_v25, %v491_v50 }
 0x15a   : > { %v514_v52 = vmax.f32 %v492_v51, 0.0 }
 0x15c   : > { %579 = vmatmul.f32.gmra.mxu2 %v514_v52 }
 0x165   : > { %v494_v53 = vpop.f32.mrf.mxu3 }
 0x166   : > { %v495_v54 = vadd.f32 %v1029_v25, %v494_v53 }
 0x168   : > { %v515_v55 = vmax.f32 %v495_v54, 0.0 }
 0x16a   : > { %582 = vmatmul.f32.vlgmr.msrb.gmra.mxu3 %v515_v55 }
 0x16d   : > { %v497_v56 = vpop.f32.mrf.mxu3 }
 0x16e   : > { %v498_v57 = vadd.f32 %v1029_v25, %v497_v56 }
 0x170   : > { %v516_v58 = vmax.f32 %v498_v57, 0.0 }
 0x172   : > { %585 = vmatmul.f32.gmra.mxu3 %v516_v58 }
 0x175   : > { %v500_v59 = vpop.f32.mrf.mxu3 }
 0x176   : > { %v501_v60 = vadd.f32 %v1029_v25, %v500_v59 }
 0x178   : > { %v517_v61 = vmax.f32 %v501_v60, 0.0 }
 0x17a   : > { %588 = vmatmul.f32.gmra.mxu3 %v517_v61 }
 0x17d   : > { %v503_v62 = vpop.f32.mrf.mxu3 }
 0x17e   : > { %v504_v63 = vadd.f32 %v1029_v25, %v503_v62 }
 0x180   : > { %v518_v0 = vmax.f32 %v504_v63, 0.0 }
 0x182   : > { %591 = vmatmul.f32.gmra.mxu3 %v518_v0 }
 0x19f   : > { %v556_v2 = vpop.f32.mrf.mxu2 }
 0x1a0   : > { %v557_v3 = vadd.f32 %v1030_v1, %v556_v2 }
 0x1a2   : > { %596 = vst.msk [vmem:[%s1363_s17] sm:$0xff] %vm595_vm1, %v557_v3 }
 0x1a7   : > { %v559_v4 = vpop.f32.mrf.mxu2 }
 0x1a8   : > { %v560_v5 = vadd.f32 %v1030_v1, %v559_v4 }
 0x1aa   : > { %597 = vst.msk [vmem:[%s1363_s17 + $0x8] sm:$0xff] %vm595_vm1, %v560_v5 }
 0x1af   : > { %v562_v6 = vpop.f32.mrf.mxu2 }
 0x1b0   : > { %v563_v7 = vadd.f32 %v1030_v1, %v562_v6 }
 0x1b2   : > { %598 = vst.msk [vmem:[%s1363_s17 + $0x10] sm:$0xff] %vm595_vm1, %v563_v7 }
 0x1b7   : > { %v565_v8 = vpop.f32.mrf.mxu2 }
 0x1b8   : > { %v566_v9 = vadd.f32 %v1030_v1, %v565_v8 }
 0x1ba   : > { %599 = vst.msk [vmem:[%s1363_s17 + $0x18] sm:$0xff] %vm595_vm1, %v566_v9 }
 0x1bf   : > { %v568_v10 = vpop.f32.mrf.mxu2 }
 0x1c0   : > { %v569_v11 = vadd.f32 %v1030_v1, %v568_v10 }
 0x1c2   : > { %600 = vst.msk [vmem:[%s1363_s17 + $0x20] sm:$0xff] %vm595_vm1, %v569_v11 }
 0x1c7   : > { %v571_v12 = vpop.f32.mrf.mxu2 }
 0x1c8   : > { %v572_v13 = vadd.f32 %v1030_v1, %v571_v12 }
 0x1ca   : > { %601 = vst.msk [vmem:[%s1363_s17 + $0x28] sm:$0xff] %vm595_vm1, %v572_v13 }
 0x1cf   : > { %v574_v14 = vpop.f32.mrf.mxu2 }
 0x1d0   : > { %v575_v15 = vadd.f32 %v1030_v1, %v574_v14 }
 0x1d2   : > { %602 = vst.msk [vmem:[%s1363_s17 + $0x30] sm:$0xff] %vm595_vm1, %v575_v15 }
 0x1d7   : > { %v577_v16 = vpop.f32.mrf.mxu2 }
 0x1d8   : > { %v578_v17 = vadd.f32 %v1030_v1, %v577_v16 }
 0x1da   : > { %603 = vst.msk [vmem:[%s1363_s17 + $0x38] sm:$0xff] %vm595_vm1, %v578_v17 }
 0x1df   : > { %v580_v18 = vpop.f32.mrf.mxu2 }
 0x1e0   : > { %v581_v19 = vadd.f32 %v1030_v1, %v580_v18 }
 0x1e2   : > { %604 = vst.msk [vmem:[%s1363_s17 + $0x40] sm:$0xff] %vm595_vm1, %v581_v19 }
 0x1ed   : > { %v583_v20 = vpop.f32.mrf.mxu3 }
 0x1ee   : > { %v584_v21 = vadd.f32 %v1030_v1, %v583_v20 }
 0x1f0   : > { %605 = vst.msk [vmem:[%s1363_s17 + $0x48] sm:$0xff] %vm595_vm1, %v584_v21 }
 0x1f5   : > { %v586_v22 = vpop.f32.mrf.mxu3 }
 0x1f6   : > { %v587_v23 = vadd.f32 %v1030_v1, %v586_v22 }
 0x1f8   : > { %606 = vst.msk [vmem:[%s1363_s17 + $0x50] sm:$0xff] %vm595_vm1, %v587_v23 }
 0x1fd   : > { %v589_v24 = vpop.f32.mrf.mxu3 }
 0x1fe   : > { %v590_v25 = vadd.f32 %v1030_v1, %v589_v24 }
 0x200   : > { %607 = vst.msk [vmem:[%s1363_s17 + $0x58] sm:$0xff] %vm595_vm1, %v590_v25 }
 0x204   : > { %615 = sbr.rel (!%p1190_p4) target bundleno = 581 (0x245), region = 52 }
 0x205   : > { %v592_v26 = vpop.f32.mrf.mxu3 }
 0x206   : > { %v593_v27 = vadd.f32 %v1030_v1, %v592_v26 }
 0x208   : > { %608 = vst.msk [vmem:[%s1363_s17 + $0x60] sm:$0xff] %vm595_vm1, %v593_v27 }
 0x209   : > { %s1502_s24 = smov (!%p618_p8, %s617_s24), 13 }
 0x20a   : > { %s893_s22 = sshll.u32 %s1502_s24, 3 }
 0x20b   : > { %p896_p9 = scmp.eq.s32.totalorder %s893_s22, 0 }
 0x20c   : > { %1031 = sdivrem.u32 (!%p896_p9), %s1502_s24, 13 }
 0x20d   : > { %626 = sbr.rel (%p896_p9) target bundleno = 581 (0x245), region = 56 }
 0x215   : > { %s1404_s9 = spop.drf %1031 }
 0x216   : > { %s1033_s26 = spop.drf %1031  ;;  %p897_p10 = scmp.le.s32.totalorder %s1404_s9, 0 }
 0x217   : > { %s1493_s27 = smov (!%p897_p10), %s1398_s21  ;;  %s1494_s14 = smov (!%p897_p10), %s1363_s17 }
 0x218   : > { %831 = sbr.rel (%p897_p10) target bundleno = 555 (0x22b), region = 132  ;;  %s1413_s29 = smov (!%p897_p10), 0  }
 0x219   : > { %s1415_s30 = smov (!%p897_p10), 0  }
 0x21d LB: >> { %v715_v28 = vld [vmem:[%s1099_s14] sm:$0xff]  ;;  %v717_v29 = vld [vmem:[%s1099_s14 + $0x8] sm:$0xff]  ;;  %v719_v30 = vld [vmem:[%s1099_s14 + $0x10] sm:$0xff]  ;;  %s741_s10 = sadd.s32 1, %s1103_s29  ;;  %s709_s30 = sadd.s32 1, %s1107_s30   ;;  %s1107_s30 = sphi %s1415_s30, %s709_s30   ;;  %s1103_s29 = sphi %s1413_s29, %s1497_s29   ;;  %s1099_s14 = sphi %s1494_s14, %s1496_s14   ;;  %s1095_s27 = sphi %s1493_s27, %s1495_s27  }
 0x21e   : >> { %716 = vst [vmem:[%s1095_s27] sm:$0xff] %v715_v28  ;;  %v721_v31 = vld [vmem:[%s1099_s14 + $0x18] sm:$0xff]  ;;  %p742_p11 = scmp.ge.s32.totalorder %s741_s10, %s1404_s9  ;;  %v723_v32 = vld [vmem:[%s1099_s14 + $0x20] sm:$0xff]  ;;  %v725_v33 = vld [vmem:[%s1099_s14 + $0x28] sm:$0xff]  ;;  %p708_p12 = scmp.ge.s32.totalorder %s709_s30, %s1404_s9 }
 0x21f   : >> { %718 = vst [vmem:[%s1095_s27 + $0x8] sm:$0xff] %v717_v29  ;;  %v727_v34 = vld [vmem:[%s1099_s14 + $0x30] sm:$0xff]  ;;  %v729_v35 = vld [vmem:[%s1099_s14 + $0x38] sm:$0xff]  ;;  %v731_v36 = vld [vmem:[%s1099_s14 + $0x40] sm:$0xff] }
 0x220   : >> { %720 = vst [vmem:[%s1095_s27 + $0x10] sm:$0xff] %v719_v30  ;;  %s1504_s10 = smov (%p742_p11, %s741_s10), 0  ;;  %v733_v37 = vld [vmem:[%s1099_s14 + $0x48] sm:$0xff]  ;;  %v735_v38 = vld [vmem:[%s1099_s14 + $0x50] sm:$0xff]  ;;  %v737_v39 = vld [vmem:[%s1099_s14 + $0x58] sm:$0xff] }
 0x221   : >> { %722 = vst [vmem:[%s1095_s27 + $0x18] sm:$0xff] %v721_v31  ;;  %s744_s23 = smul.u32 104, %s1504_s10  ;;  %v739_v40 = vld [vmem:[%s1099_s14 + $0x60] sm:$0xff]  ;;  %s1497_s29 = smov %s1504_s10 }
 0x222   : >> { %724 = vst [vmem:[%s1095_s27 + $0x20] sm:$0xff] %v723_v32 }
 0x223   : >> { %726 = vst [vmem:[%s1095_s27 + $0x28] sm:$0xff] %v725_v33  ;;  %s746_s11 = scalar_lea.vmem %s1363_s17, %s744_s23 [#allocation2]   ;;  %s747_s12 = scalar_lea.vmem %s1398_s21, %s744_s23  }
 0x224   : >> { %728 = vst [vmem:[%s1095_s27 + $0x30] sm:$0xff] %v727_v34  ;;  %s1496_s14 = smov %s746_s11 }
 0x225   : >> { %730 = vst [vmem:[%s1095_s27 + $0x38] sm:$0xff] %v729_v35 }
 0x226   : >> { %732 = vst [vmem:[%s1095_s27 + $0x40] sm:$0xff] %v731_v36  ;;  %711 = sbr.rel (!%p708_p12) target bundleno = 541 (0x21d), region = 138 }
 0x227   : >> { %734 = vst [vmem:[%s1095_s27 + $0x48] sm:$0xff] %v733_v37 }
 0x228   : >> { %736 = vst [vmem:[%s1095_s27 + $0x50] sm:$0xff] %v735_v38 }
 0x229   : >> { %738 = vst [vmem:[%s1095_s27 + $0x58] sm:$0xff] %v737_v39 }
 0x22a   : >> { %740 = vst [vmem:[%s1095_s27 + $0x60] sm:$0xff] %v739_v40  ;;  %s1495_s27 = smov %s747_s12 }
 0x22b PF: > { %1034 = sdivrem.u32 %s1502_s24, 13 }
 0x22c   : > { %s898_s13 = smul.u32 104, %s1404_s9 }
 0x22e   : > { %s1469_s15 = scalar_lea.vmem %s1363_s17, %s898_s13 [#allocation2]   ;;  %s754_s16 = scalar_lea.vmem %s1398_s21, %s898_s13  }
 0x234   : > { %s1035_s18 = spop.drf %1034 }
 0x235   : > { %s1036_s19 = spop.drf %1034 }
 0x236   : > { %p900_p13 = scmp.le.s32.totalorder %s1036_s19, 0 }
 0x237   : > { %s1109_s20 = smov (!%p900_p13), %s754_s16   ;;  %s1113_s22 = smov (!%p900_p13), %s1469_s15  }
 0x238   : > { %845 = sbr.rel (%p900_p13) target bundleno = 581 (0x245), region = 143  ;;  %s1117_s26 = smov (!%p900_p13), 0  }
 0x239   : > { %s1121_s30 = smov (!%p900_p13), 0  }
 0x23d LB: >> { %v764_v41 = vld [vmem:[%s1115_s22] sm:$0xff]  ;;  %s766_s17 = sadd.s32 1, %s1119_s26  ;;  %s758_s30 = sadd.s32 1, %s1123_s30   ;;  %s1123_s30 = sphi %s1121_s30, %s758_s30   ;;  %s1119_s26 = sphi %s1117_s26, %s1118_s26   ;;  %s1115_s22 = sphi %s1113_s22, %s771_s22   ;;  %s1111_s20 = sphi %s1109_s20, %s772_s20  }
 0x23e   : >> { %765 = vst [vmem:[%s1111_s20] sm:$0xff] %v764_v41  ;;  %p767_p0 = scmp.ge.s32.totalorder %s766_s17, %s1036_s19  ;;  %p757_p1 = scmp.ge.s32.totalorder %s758_s30, %s1036_s19 }
 0x240   : >> { %s1506_s17 = smov (%p767_p0, %s766_s17), 0  ;;  %760 = sbr.rel (!%p757_p1) target bundleno = 573 (0x23d), region = 149 }
 0x241   : >> { %s901_s24 = sshll.u32 %s1506_s17, 3  ;;  %s1118_s26 = smov %s1506_s17  }
 0x242   : >> { %s771_s22 = scalar_lea.vmem %s1469_s15, %s901_s24 [#allocation2]   ;;  %s772_s20 = scalar_lea.vmem %s754_s16, %s901_s24  }
 0x245 PF: > { %p14_p2 = scmp.ge.s32.totalorder %s1180_s28, 4   ;;  %s1498_s24 = smov %s1087_s25 }
 0x246   : > { %s1499_s25 = smov %s1188_s8  ;;  %s1500_s26 = smov %s1180_s28 }
 0x247   :  { %16 = sbr.rel (!%p14_p2) target bundleno = 2 (0x2), region = 160 }

</bundles_post_ra>
